<compile_context>
chip_gen: v5e
topology: v5e:2x2
jax: 0.10.0
libtpu: 0.0.40
codegen_flags: <defaults>
</compile_context>

<pallas_src>
import functools

import jax
import jax.numpy as jnp
from jax.experimental import pallas as pl
from jax.experimental.pallas import tpu as pltpu


# ----------------------------------------------------------------------------
# Fused encoder + (3x) decoder kernel.  One grid step per batch element.
# All activations are kept transposed: hidden on sublanes, points T on lanes.
# ----------------------------------------------------------------------------
def _onet_fused_kernel(img_ref, p_ref, wp_ref, wc_ref, bin_ref, w1_ref, b1_ref,
                       wo_ref, out_ref, *, inv_hw, bo_sum):
    # img_ref: (1, C, HW)      p_ref:  (1, 3, T)
    # wp_ref:  (3H, 3)         wc_ref: (3H, C)   (encoder heads folded in)
    # bin_ref: (3H, 1)         w1_ref: (3H, 3H)  (block-diag of the 3 decoders)
    # b1_ref:  (3H, 1)         wo_ref: (1, 3H)   (ratios folded in)
    # out_ref: (1, 1, T)
    img = img_ref[0]                                              # (C, HW)
    pooled = jnp.sum(img, axis=1, keepdims=True) * inv_hw         # (C, 1) mean pool
    pT = p_ref[0]                                                 # (3, T)

    # Conditional-path contribution (per-batch, independent of T): (3H, 1)
    hc = jnp.dot(wc_ref[...], pooled, preferred_element_type=jnp.float32)

    # Layer 1 for all three decoders at once: (3H, T)
    h = (jnp.dot(wp_ref[...], pT, preferred_element_type=jnp.float32)
         + (hc + bin_ref[...]))
    h = jnp.maximum(h, 0.0)

    # Residual block: h = h + relu(h) @ W1 + b1; h >= 0 so relu(h) == h.
    h = h + jnp.dot(w1_ref[...], h, preferred_element_type=jnp.float32) + b1_ref[...]

    # Combined, ratio-weighted output head: (1, T)
    logits = (jnp.dot(wo_ref[...], jnp.maximum(h, 0.0),
                      preferred_element_type=jnp.float32) + bo_sum)
    out_ref[0] = logits


# ----------------------------------------------------------------------------
# Python wrapper (the "OccupancyNetwork.forward" equivalent).
# ----------------------------------------------------------------------------
class OccupancyNetworkPallas:
    def __init__(self, c_channels, c_dim, hidden, logits1_ratio=1.0,
                 logits2_ratio=1.0, seed=0):
        self.c_channels = c_channels
        self.c_dim = c_dim
        self.hidden = hidden
        self.logits1_ratio = float(logits1_ratio)
        self.logits2_ratio = float(logits2_ratio)

        key = jax.random.PRNGKey(seed)
        ks = jax.random.split(key, 9)
        s = 0.1
        # --- original (unfolded) parameters; index d: 0->decoder1, 1->2, 2->3
        self.enc_w = s * jax.random.normal(ks[0], (3, c_channels, c_dim), jnp.float32)
        self.enc_b = s * jax.random.normal(ks[1], (3, c_dim), jnp.float32)
        self.wp = s * jax.random.normal(ks[2], (3, 3, hidden), jnp.float32)
        self.bp = s * jax.random.normal(ks[3], (3, hidden), jnp.float32)
        self.wc = s * jax.random.normal(ks[4], (3, c_dim, hidden), jnp.float32)
        self.w1 = s * jax.random.normal(ks[5], (3, hidden, hidden), jnp.float32)
        self.b1 = s * jax.random.normal(ks[6], (3, hidden), jnp.float32)
        self.wo = s * jax.random.normal(ks[7], (3, hidden, 1), jnp.float32)
        self.bo = s * jax.random.normal(ks[8], (3, 1), jnp.float32)

        # --- host-side fold / batching of the three decoders (exact linear algebra)
        H = hidden
        ratios = jnp.array([self.logits1_ratio, self.logits2_ratio, 1.0], jnp.float32)

        # Layer-1 point weights, concatenated along the hidden axis: (3, 3H) -> T
        wp_cat = jnp.concatenate([self.wp[0], self.wp[1], self.wp[2]], axis=1)
        self.win_p = jnp.transpose(wp_cat)                           # (3H, 3)

        # Encoder heads folded into the conditional path:
        #   f_d @ wc_d = pooled @ (enc_w_d @ wc_d) + enc_b_d @ wc_d
        wpc = jnp.einsum('dck,dkh->dch', self.enc_w, self.wc)        # (3, C, H)
        wpc_cat = jnp.concatenate([wpc[0], wpc[1], wpc[2]], axis=1)  # (C, 3H)
        self.win_c = jnp.transpose(wpc_cat)                          # (3H, C)

        bin_cat = (jnp.einsum('dk,dkh->dh', self.enc_b, self.wc) + self.bp)  # (3, H)
        self.bin = bin_cat.reshape(3 * H)[:, None]                   # (3H, 1)

        # Residual weight: block-diagonal of the three decoders (transposed blocks).
        self.w1bdT = jax.scipy.linalg.block_diag(
            self.w1[0].T, self.w1[1].T, self.w1[2].T)                # (3H, 3H)
        self.b1c = self.b1.reshape(3 * H)[:, None]                   # (3H, 1)

        # Output heads with the logits ratios folded in.
        self.wo_row = (ratios[:, None] * self.wo[:, :, 0]).reshape(3 * H)[None, :]  # (1, 3H)
        self.bo_sum = float(jnp.sum(ratios * self.bo[:, 0]))

    # ---- get_z_from_prior (empty prior, z_dim == 0 as in the reference) ----
    def get_z_from_prior(self, batch_size, sample=True):
        return jnp.zeros((batch_size, 0), jnp.float32)

    # ---- forward -----------------------------------------------------------
    def forward(self, p, inputs, sample=True):
        # p: (B, T, 3)   inputs: NCHW (B, C, Himg, Wimg)
        B, T, _ = p.shape
        _, C, Hi, Wi = inputs.shape
        HW = Hi * Wi
        H3 = 3 * self.hidden

        img = inputs.reshape(B, C, HW)             # spatial already last in NCHW
        pT = jnp.transpose(p, (0, 2, 1))           # (B, 3, T): T on lanes

        _ = self.get_z_from_prior(B, sample=sample)  # z_dim == 0, unused downstream

        kernel = functools.partial(_onet_fused_kernel,
                                   inv_hw=1.0 / HW, bo_sum=self.bo_sum)
        logits = pl.pallas_call(
            kernel,
            out_shape=jax.ShapeDtypeStruct((B, 1, T), jnp.float32),
            grid=(B,),
            in_specs=[
                pl.BlockSpec((1, C, HW), lambda b: (b, 0, 0)),
                pl.BlockSpec((1, 3, T), lambda b: (b, 0, 0)),
                pl.BlockSpec((H3, 3), lambda b: (0, 0)),
                pl.BlockSpec((H3, C), lambda b: (0, 0)),
                pl.BlockSpec((H3, 1), lambda b: (0, 0)),
                pl.BlockSpec((H3, H3), lambda b: (0, 0)),
                pl.BlockSpec((H3, 1), lambda b: (0, 0)),
                pl.BlockSpec((1, H3), lambda b: (0, 0)),
            ],
            out_specs=pl.BlockSpec((1, 1, T), lambda b: (b, 0, 0)),
            compiler_params=pltpu.CompilerParams(
                dimension_semantics=("parallel",)),
        )(img, pT, self.win_p, self.win_c, self.bin, self.w1bdT, self.b1c,
          self.wo_row)

        logits = logits[:, 0, :]                   # (B, T)
        probs = jax.nn.sigmoid(logits)             # Bernoulli(logits=logits).probs
        return logits, probs


# ----------------------------------------------------------------------------
# Pure-JAX reference (unfolded weights) for a correctness check.
# ----------------------------------------------------------------------------
def _reference_forward(net, p, inputs):
    B, C, Hi, Wi = inputs.shape
    pooled = inputs.reshape(B, C, Hi * Wi).mean(axis=-1)             # (B, C)
    ratios = (net.logits1_ratio, net.logits2_ratio, 1.0)
    logits = jnp.zeros(p.shape[:2], jnp.float32)
    for d in range(3):
        f_d = pooled @ net.enc_w[d] + net.enc_b[d]                   # (B, CD)
        h = (jnp.einsum('btk,kh->bth', p, net.wp[d])
             + (f_d @ net.wc[d])[:, None, :] + net.bp[d])
        h = jnp.maximum(h, 0.0)
        h = h + jnp.maximum(h, 0.0) @ net.w1[d] + net.b1[d]
        ld = jnp.maximum(h, 0.0) @ net.wo[d] + net.bo[d]             # (B, T, 1)
        logits = logits + ratios[d] * ld[..., 0]
    return logits


# ----------------------------------------------------------------------------
if __name__ == "__main__":
    key = jax.random.PRNGKey(0)
    k_p, k_in = jax.random.split(key)

    B, C, Himg, Wimg = 2, 4, 16, 16     # conditioning image (NCHW)
    T = 64                              # number of query points
    CD, HID = 16, 32                    # feature dim / decoder hidden dim

    p = jax.random.uniform(k_p, (B, T, 3), jnp.float32, minval=-0.5, maxval=0.5)
    inputs = jax.random.normal(k_in, (B, C, Himg, Wimg), jnp.float32)

    net = OccupancyNetworkPallas(c_channels=C, c_dim=CD, hidden=HID,
                                 logits1_ratio=1.0, logits2_ratio=1.0, seed=0)

    logits, probs = net.forward(p, inputs, sample=True)
    jax.block_until_ready(logits)
    jax.block_until_ready(probs)

    assert logits.shape == (B, T) and probs.shape == (B, T)
    assert bool(jnp.all(jnp.isfinite(logits)))

    ref = _reference_forward(net, p, inputs)
    max_err = float(jnp.max(jnp.abs(logits - ref)))
    assert max_err < 5e-4, f"mismatch vs reference: {max_err}"

    print("KERNEL_OK")
</pallas_src>

<mosaic_0001>
module attributes {stable_mosaic.version = 11 : i64} {
  func.func @_onet_fused_kernel(%arg0: i32, %arg1: memref<1x4x256xf32, #tpu.memory_space<vmem>>, %arg2: memref<1x3x64xf32, #tpu.memory_space<vmem>>, %arg3: memref<96x3xf32, #tpu.memory_space<vmem>>, %arg4: memref<96x4xf32, #tpu.memory_space<vmem>>, %arg5: memref<96x1xf32, #tpu.memory_space<vmem>>, %arg6: memref<96x96xf32, #tpu.memory_space<vmem>>, %arg7: memref<96x1xf32, #tpu.memory_space<vmem>>, %arg8: memref<1x96xf32, #tpu.memory_space<vmem>>, %arg9: memref<1x1x64xf32, #tpu.memory_space<vmem>>) attributes {dimension_semantics = [#tpu.dimension_semantics<parallel>], iteration_bounds = array<i64: 2>, scalar_prefetch = 0 : i64, scratch_operands = 0 : i64, tpu.core_type = #tpu.core_type<tc>, window_params = [{transform_indices = @transform_0, window_bounds = array<i64: 1, 4, 256>}, {transform_indices = @transform_1, window_bounds = array<i64: 1, 3, 64>}, {pipeline_mode = #tpu.pipeline_mode<synchronous>, transform_indices = @transform_2, window_bounds = array<i64: 96, 3>}, {pipeline_mode = #tpu.pipeline_mode<synchronous>, transform_indices = @transform_3, window_bounds = array<i64: 96, 4>}, {pipeline_mode = #tpu.pipeline_mode<synchronous>, transform_indices = @transform_4, window_bounds = array<i64: 96, 1>}, {pipeline_mode = #tpu.pipeline_mode<synchronous>, transform_indices = @transform_5, window_bounds = array<i64: 96, 96>}, {pipeline_mode = #tpu.pipeline_mode<synchronous>, transform_indices = @transform_6, window_bounds = array<i64: 96, 1>}, {pipeline_mode = #tpu.pipeline_mode<synchronous>, transform_indices = @transform_7, window_bounds = array<i64: 1, 96>}, {transform_indices = @transform_8, window_bounds = array<i64: 1, 1, 64>}]} {
    %c0 = arith.constant 0 : index
    %c0_0 = arith.constant 0 : index
    %c0_1 = arith.constant 0 : index
    %0 = vector.load %arg1[%c0, %c0_0, %c0_1] : memref<1x4x256xf32, #tpu.memory_space<vmem>>, vector<1x4x256xf32>
    %1 = vector.shape_cast %0 : vector<1x4x256xf32> to vector<4x256xf32>
    %cst = arith.constant dense<0.000000e+00> : vector<4xf32>
    %2 = vector.multi_reduction <add>, %1, %cst [1] : vector<4x256xf32> to vector<4xf32>
    %3 = vector.shape_cast %2 : vector<4xf32> to vector<4x1xf32>
    %cst_2 = arith.constant 3.906250e-03 : f32
    %4 = vector.broadcast %cst_2 : f32 to vector<4x1xf32>
    %5 = arith.mulf %3, %4 : vector<4x1xf32>
    %c0_3 = arith.constant 0 : index
    %c0_4 = arith.constant 0 : index
    %c0_5 = arith.constant 0 : index
    %6 = vector.load %arg2[%c0_3, %c0_4, %c0_5] : memref<1x3x64xf32, #tpu.memory_space<vmem>>, vector<1x3x64xf32>
    %7 = vector.shape_cast %6 : vector<1x3x64xf32> to vector<3x64xf32>
    %c0_6 = arith.constant 0 : index
    %c0_7 = arith.constant 0 : index
    %8 = vector.load %arg4[%c0_6, %c0_7] : memref<96x4xf32, #tpu.memory_space<vmem>>, vector<96x4xf32>
    %cst_8 = arith.constant dense<0.000000e+00> : vector<96x1xf32>
    %9 = tpu.matmul %8, %5, %cst_8 {dimension_numbers = #tpu.dot_dimension_numbers<[1], [0], [0], [1], [0, 0, 1, 1], [], []>} : vector<96x4xf32>, vector<4x1xf32>, vector<96x1xf32> -> vector<96x1xf32>
    %c0_9 = arith.constant 0 : index
    %c0_10 = arith.constant 0 : index
    %10 = vector.load %arg3[%c0_9, %c0_10] : memref<96x3xf32, #tpu.memory_space<vmem>>, vector<96x3xf32>
    %cst_11 = arith.constant dense<0.000000e+00> : vector<96x64xf32>
    %11 = tpu.matmul %10, %7, %cst_11 {dimension_numbers = #tpu.dot_dimension_numbers<[1], [0], [0], [1], [0, 0, 1, 1], [], []>} : vector<96x3xf32>, vector<3x64xf32>, vector<96x64xf32> -> vector<96x64xf32>
    %c0_12 = arith.constant 0 : index
    %c0_13 = arith.constant 0 : index
    %12 = vector.load %arg5[%c0_12, %c0_13] : memref<96x1xf32, #tpu.memory_space<vmem>>, vector<96x1xf32>
    %13 = arith.addf %9, %12 : vector<96x1xf32>
    %14 = vector.broadcast %13 : vector<96x1xf32> to vector<96x64xf32>
    %15 = arith.addf %11, %14 : vector<96x64xf32>
    %cst_14 = arith.constant 0.000000e+00 : f32
    %16 = vector.broadcast %cst_14 : f32 to vector<96x64xf32>
    %17 = arith.maximumf %15, %16 : vector<96x64xf32>
    %c0_15 = arith.constant 0 : index
    %c0_16 = arith.constant 0 : index
    %18 = vector.load %arg6[%c0_15, %c0_16] : memref<96x96xf32, #tpu.memory_space<vmem>>, vector<96x96xf32>
    %cst_17 = arith.constant dense<0.000000e+00> : vector<96x64xf32>
    %19 = tpu.matmul %18, %17, %cst_17 {dimension_numbers = #tpu.dot_dimension_numbers<[1], [0], [0], [1], [0, 0, 1, 1], [], []>} : vector<96x96xf32>, vector<96x64xf32>, vector<96x64xf32> -> vector<96x64xf32>
    %20 = arith.addf %17, %19 : vector<96x64xf32>
    %c0_18 = arith.constant 0 : index
    %c0_19 = arith.constant 0 : index
    %21 = vector.load %arg7[%c0_18, %c0_19] : memref<96x1xf32, #tpu.memory_space<vmem>>, vector<96x1xf32>
    %22 = vector.broadcast %21 : vector<96x1xf32> to vector<96x64xf32>
    %23 = arith.addf %20, %22 : vector<96x64xf32>
    %c0_20 = arith.constant 0 : index
    %c0_21 = arith.constant 0 : index
    %24 = vector.load %arg8[%c0_20, %c0_21] : memref<1x96xf32, #tpu.memory_space<vmem>>, vector<1x96xf32>
    %cst_22 = arith.constant 0.000000e+00 : f32
    %25 = vector.broadcast %cst_22 : f32 to vector<96x64xf32>
    %26 = arith.maximumf %23, %25 : vector<96x64xf32>
    %cst_23 = arith.constant dense<0.000000e+00> : vector<1x64xf32>
    %27 = tpu.matmul %24, %26, %cst_23 {dimension_numbers = #tpu.dot_dimension_numbers<[1], [0], [0], [1], [0, 0, 1, 1], [], []>} : vector<1x96xf32>, vector<96x64xf32>, vector<1x64xf32> -> vector<1x64xf32>
    %cst_24 = arith.constant -0.153387219 : f32
    %28 = vector.broadcast %cst_24 : f32 to vector<1x64xf32>
    %29 = arith.addf %27, %28 : vector<1x64xf32>
    %c0_25 = arith.constant 0 : index
    %c0_26 = arith.constant 0 : index
    %c0_27 = arith.constant 0 : index
    %30 = vector.load %arg9[%c0_25, %c0_26, %c0_27] : memref<1x1x64xf32, #tpu.memory_space<vmem>>, vector<1x1x64xf32>
    %31 = vector.shape_cast %30 : vector<1x1x64xf32> to vector<1x64xf32>
    %32 = vector.shape_cast %29 : vector<1x64xf32> to vector<1x1x64xf32>
    tpu.vector_store %arg9[%c0_25, %c0_26, %c0_27], %32 {strides = array<i32>} : memref<1x1x64xf32, #tpu.memory_space<vmem>>, vector<1x1x64xf32>,
    return
  }
  func.func @transform_0(%arg0: i32) -> (i32, i32, i32) {
    %c0_i32 = arith.constant 0 : i32
    %c0_i32_0 = arith.constant 0 : i32
    %c0_i32_1 = arith.constant 0 : i32
    return %arg0, %c0_i32, %c0_i32_0 : i32, i32, i32
  }
  func.func @transform_1(%arg0: i32) -> (i32, i32, i32) {
    %c0_i32 = arith.constant 0 : i32
    %c0_i32_0 = arith.constant 0 : i32
    %c0_i32_1 = arith.constant 0 : i32
    return %arg0, %c0_i32, %c0_i32_0 : i32, i32, i32
  }
  func.func @transform_2(%arg0: i32) -> (i32, i32) {
    %c0_i32 = arith.constant 0 : i32
    %c0_i32_0 = arith.constant 0 : i32
    %c0_i32_1 = arith.constant 0 : i32
    return %c0_i32, %c0_i32_0 : i32, i32
  }
  func.func @transform_3(%arg0: i32) -> (i32, i32) {
    %c0_i32 = arith.constant 0 : i32
    %c0_i32_0 = arith.constant 0 : i32
    %c0_i32_1 = arith.constant 0 : i32
    return %c0_i32, %c0_i32_0 : i32, i32
  }
  func.func @transform_4(%arg0: i32) -> (i32, i32) {
    %c0_i32 = arith.constant 0 : i32
    %c0_i32_0 = arith.constant 0 : i32
    %c0_i32_1 = arith.constant 0 : i32
    return %c0_i32, %c0_i32_0 : i32, i32
  }
  func.func @transform_5(%arg0: i32) -> (i32, i32) {
    %c0_i32 = arith.constant 0 : i32
    %c0_i32_0 = arith.constant 0 : i32
    %c0_i32_1 = arith.constant 0 : i32
    return %c0_i32, %c0_i32_0 : i32, i32
  }
  func.func @transform_6(%arg0: i32) -> (i32, i32) {
    %c0_i32 = arith.constant 0 : i32
    %c0_i32_0 = arith.constant 0 : i32
    %c0_i32_1 = arith.constant 0 : i32
    return %c0_i32, %c0_i32_0 : i32, i32
  }
  func.func @transform_7(%arg0: i32) -> (i32, i32) {
    %c0_i32 = arith.constant 0 : i32
    %c0_i32_0 = arith.constant 0 : i32
    %c0_i32_1 = arith.constant 0 : i32
    return %c0_i32, %c0_i32_0 : i32, i32
  }
  func.func @transform_8(%arg0: i32) -> (i32, i32, i32) {
    %c0_i32 = arith.constant 0 : i32
    %c0_i32_0 = arith.constant 0 : i32
    %c0_i32_1 = arith.constant 0 : i32
    return %arg0, %c0_i32, %c0_i32_0 : i32, i32, i32
  }
}

</mosaic_0001>

<bundles_post_ra>
// kernel: tpu_custom_call.1
= control target key start
LH: loop header
LB: loop body
LE: loop exit
PB: predicated region body
PF: predicated region fallthrough
CT: control target
= control target key end

     0   :  { %13 = vsyncpa [#allocation3], 0  ;;  %s1544_s0 = inlined_call_operand.vmem [shape: f32[2,4,256], index: 0, kind: input, shape index: {}]   ;;  %s1545_s1 = inlined_call_operand.vmem [shape: f32[2,3,64], index: 1, kind: input, shape index: {}]   ;;  %s1546_s2 = inlined_call_operand.vmem [shape: f32[96,3], index: 2, kind: input, shape index: {}]   ;;  %s1547_s3 = inlined_call_operand.vmem [shape: f32[96,4], index: 3, kind: input, shape index: {}]   ;;  %s1548_s4 = inlined_call_operand.vmem [shape: f32[96,1], index: 4, kind: input, shape index: {}]   ;;  %s1549_s5 = inlined_call_operand.vmem [shape: f32[96,96], index: 5, kind: input, shape index: {}]   ;;  %s1550_s6 = inlined_call_operand.vmem [shape: f32[96,1], index: 6, kind: input, shape index: {}]   ;;  %s1551_s7 = inlined_call_operand.vmem [shape: f32[1,96], index: 7, kind: input, shape index: {}]   ;;  %s1552_s8 = inlined_call_operand.hbm [shape: f32[2,1,64], index: 8, kind: output, shape index: {}]  }
   0x1   :  { %15 = vsyncpa [#allocation3 + $0x1], 0  ;;  %s1160_s27 = smov 0   ;;  %s1162_s28 = smov 0  }
   0x2   :  { %s1164_s29 = smov 0   ;;  %s1166_s30 = smov 0  }
   0x3 LB: > { %s1181_s9 = sadd.s32 4294967295, %s1112_s30   ;;  %s946_s10 = sadd.s32 4294967294, %s1112_s30   ;;  %s1112_s30 = sphi %s1166_s30, %s1558_s30   ;;  %s1108_s29 = sphi %s1164_s29, %s1557_s29   ;;  %s1104_s28 = sphi %s1162_s28, %s1556_s28   ;;  %s1100_s27 = sphi %s1160_s27, %s1555_s27  }
   0x4   : > { %s1185_s11 = sadd.s32 1, %s1112_s30   ;;  %s206_s12 = sadd.s32 1, %s1108_s29 }
   0x5   : > { %s203_s13 = ssub.s32 %s1112_s30, %s1185_s11  ;;  %p216_p0 = scmp.ne.s32.totalorder %s1108_s29, %s1104_s28 }
   0x6   : > { %p204_p1 = scmp.eq.s32.totalorder %s203_s13, 0  ;;  %p217_p2 = scmp.eq.s32.totalorder %s1181_s9, 1 }
   0x7   : > { %p222_p3 = scmp.ne.s32.totalorder %s1104_s28, %s1100_s27  ;;  %p223_p4 = scmp.eq.s32.totalorder %s946_s10, 1 }
   0x8   : > { %s1196_s14 = scalar_select %p204_p1, %s1108_s29, %s206_s12  }
   0x9   : > { %p1198_p5 = por %p217_p2, %p216_p0  ;;  %p1202_p6 = por %p223_p4, %p222_p3 }
   0xa   : > { %p949_p7 = scmp.ge.s32.totalorder %s1112_s30, 1  ;;  %p274_p8 = scmp.lt.s32.totalorder %s1112_s30, 3 }
   0xc   : > { %p275_p9 = pnand %p949_p7, %p274_p8 }
   0xd   : > { %p311_p10 = scmp.lt.s32.totalorder (!%p275_p9), %s1181_s9, 1  ;;  %s875_s22 = scalar_lea.hbm (!%p275_p9), %s1552_s8, %s1181_s9 }
   0xe   : > { %278 = sbr.rel (%p275_p9) target bundleno = 868 (0x364), region = 52  ;;  %s879_s25 = sshll.u32 (!%p275_p9), %s875_s22, 4  ;;  %s880_s25 = int_to_ptr.hbm [resolvable:$true] %s879_s25 }
   0xf   : > { %s1064_s10 = sshra.s32 (!%p275_p9), %s880_s25, 4  ;;  %s1065_s10 = int_to_ptr.hbm [resolvable:$true] %s1064_s10 }
  0x10   : > { %s1066_s12 = scalar_lea.hbm (!%p275_p9), %s1065_s10, 1  ;;  %p1071_p0 = scmp.lt.s32.totalorder (!%p275_p9), %s1065_s10, %s1552_s8 }
  0x11   : > { %p1067_p11 = scmp.ne.s32.totalorder (!%p275_p9), %s1065_s10, %s1066_s12 }
  0x13   : > { %s1210_s17 = scalar_select %p311_p10, %s1181_s9, 1  ;;  %vm327_vm0 = vcmask 1043456   ;;  %v335_v8 = vld [vmem:[%s1547_s3] sm:$0xff]  ;;  %vm371_vm1 = vcmask 31744   ;;  %v336_v9 = vld [vmem:[%s1547_s3 + $0x8] sm:$0xff]  ;;  %v337_v10 = vld [vmem:[%s1547_s3 + $0x10] sm:$0xff] }
  0x14   : > { %v338_v11 = vld [vmem:[%s1547_s3 + $0x18] sm:$0xff]  ;;  %v339_v12 = vld [vmem:[%s1547_s3 + $0x20] sm:$0xff]  ;;  %v340_v13 = vld [vmem:[%s1547_s3 + $0x28] sm:$0xff]  ;;  %vm561_vm2 = vcmask 1042432   ;;  %vm524_vm3 = vcmask 23552   ;;  %v1114_v36 = vmov 0   ;;  %p1068_p12 = pnand %p1067_p11, %p1198_p5 }
  0x15   : > { %s994_s18 = sshll.u32 %s1210_s17, 3  ;;  %v341_v14 = vld [vmem:[%s1547_s3 + $0x30] sm:$0xff]  ;;  %s952_s24 = sshll.u32 %s1210_s17, 2  ;;  %v342_v15 = vld [vmem:[%s1547_s3 + $0x38] sm:$0xff]  ;;  %v347_v17 = vld [vmem:[%s1546_s2] sm:$0xff]  ;;  %1049 = vset.pattern.permute.xlu2 %v1114_v36  ;;  %1048 = vset.pattern.permute.xlu1 %v1114_v36  ;;  %vm642_vm4 = vcmask 785408  }
  0x16   : > { %s315_s21 = scalar_lea.vmem %s1544_s0, %s994_s18  ;;  %s319_s13 = scalar_lea.vmem %s1545_s1, %s952_s24  ;;  %v343_v18 = vld [vmem:[%s1547_s3 + $0x40] sm:$0xff]  ;;  %v348_v19 = vld [vmem:[%s1546_s2 + $0x8] sm:$0xff]  ;;  %v349_v21 = vld [vmem:[%s1546_s2 + $0x10] sm:$0xff]  ;;  %1047 = vset.pattern.permute.xlu0 %v1114_v36  ;;  %vm864_vm5 = vcmask 516096  }
  0x17   : > { %v320_v0 = vld [vmem:[%s315_s21] sm:$0xff]  ;;  %v344_v20 = vld [vmem:[%s1547_s3 + $0x48] sm:$0xff]  ;;  %v345_v22 = vld [vmem:[%s1547_s3 + $0x50] sm:$0xff]  ;;  %s309_s17 = sand.u32 1, %s1104_s28   ;;  %p1069_p13 = pneg %p1068_p12 }
  0x18   : > { %322 = vst [vmem:[#allocation1] ss:$2 sm:$0xff] %v320_v0  ;;  %v334_v16 = vld [vmem:[%s319_s13] sm:$0x7]  ;;  %v350_v23 = vld [vmem:[%s1546_s2 + $0x18] sm:$0xff]  ;;  %v352_v26 = vld [vmem:[%s1546_s2 + $0x28] sm:$0xff] }
  0x19   : > { %966 = vmatpush.msk.msra.mxu1 %vm561_vm2, %v334_v16  ;;  %v346_v24 = vld [vmem:[%s1547_s3 + $0x58] sm:$0xff]  ;;  %v351_v25 = vld [vmem:[%s1546_s2 + $0x20] sm:$0xff]  ;;  %v353_v27 = vld [vmem:[%s1546_s2 + $0x30] sm:$0xff]  ;;  %s310_s23 = scalar_lea.vmem [#allocation2], %s309_s17  ;;  %s867_s26 = scalar_lea.sflag [#allocation3], %s309_s17 }
  0x1a   : > { %967 = vmatmul.msk.f32.vlgmr.msra.gmra.mxu1 %vm524_vm3, %v347_v17  ;;  %v354_v28 = vld [vmem:[%s1546_s2 + $0x38] sm:$0xff]  ;;  %v355_v29 = vld [vmem:[%s1546_s2 + $0x40] sm:$0xff]  ;;  %v356_v34 = vld [vmem:[%s1546_s2 + $0x48] sm:$0xff]  ;;  %s877_s24 = sshll.u32 %s310_s23, 4  ;;  %s1070_s9 = scalar_lea.hbm %s1552_s8, 2  ;;  %s878_s24 = int_to_ptr.vmem [resolvable:$true] %s877_s24 }
  0x1b   : > { %v357_v37 = vld [vmem:[%s1546_s2 + $0x50] sm:$0xff]  ;;  %v358_v39 = vld [vmem:[%s1546_s2 + $0x58] sm:$0xff]  ;;  %v367_v42 = vld [vmem:[%s1548_s4 + $0x40] sm:$0xff]  ;;  %p1072_p1 = scmp.lt.s32.totalorder %s1070_s9, %s1066_s12 }
  0x1c   : > { %v366_v45 = vld [vmem:[%s1548_s4 + $0x38] sm:$0xff]  ;;  %v364_v48 = vld [vmem:[%s1548_s4 + $0x28] sm:$0xff]  ;;  %v369_v49 = vld [vmem:[%s1548_s4 + $0x50] sm:$0xff] }
  0x1d   : > { %v368_v53 = vld [vmem:[%s1548_s4 + $0x48] sm:$0xff]  ;;  %v370_v54 = vld [vmem:[%s1548_s4 + $0x58] sm:$0xff]  ;;  %v365_v60 = vld [vmem:[%s1548_s4 + $0x30] sm:$0xff]  ;;  %p1073_p2 = por %p1072_p1, %p1071_p0 }
  0x1e   : > { %v362_v55 = vld [vmem:[%s1548_s4 + $0x18] sm:$0xff]  ;;  %v360_v61 = vld [vmem:[%s1548_s4 + $0x8] sm:$0xff]  ;;  %v754_v63 = vld [vmem:[%s1550_s6 + $0x50] sm:$0xff] }
  0x1f   : > { %v323_v1 = vld.sshfl [vmem:[#allocation1] sm:$0xff pattern:$0x75316420]  ;;  %v324_v2 = vld.sshfl [vmem:[#allocation1 + $0x8] sm:$0xff pattern:$0x75316420]  ;;  %p1074_p3 = pnand %p1073_p2, %p1069_p13 }
  0x20   : > { %v328_v3 = vsel %vm327_vm0, %v323_v1, 0.0  ;;  %v329_v4 = vsel %vm327_vm0, %v324_v2, 0.0  ;;  %v363_v2 = vld [vmem:[%s1548_s4 + $0x20] sm:$0xff]  ;;  %v753_v17 = vld [vmem:[%s1550_s6 + $0x48] sm:$0xff] }
  0x21   : > { %v330_v5 = vadd.f32 %v329_v4, %v328_v3  ;;  %v751_v3 = vld [vmem:[%s1550_s6 + $0x38] sm:$0xff] }
  0x22   : > { %968 = vmatmul.msk.f32.gmra.mxu1 %vm524_vm3, %v348_v19 }
  0x23   : > { %331 = vadd.xlane.f32.xlu0 %v330_v5 }
  0x2a   : > { %969 = vmatmul.msk.f32.gmra.mxu1 %vm524_vm3, %v349_v21  ;;  %v747_v21 = vld [vmem:[%s1550_s6 + $0x18] sm:$0xff] }
  0x32   : > { %970 = vmatmul.msk.f32.gmra.mxu1 %vm524_vm3, %v350_v23  ;;  %v744_v23 = vld [vmem:[%s1550_s6] sm:$0xff] }
  0x3a   : > { %971 = vmatmul.msk.f32.gmra.mxu1 %vm524_vm3, %v351_v25 }
  0x42   : > { %972 = vmatmul.msk.f32.gmra.mxu1 %vm524_vm3, %v352_v26 }
  0x4a   : > { %973 = vmatmul.msk.f32.gmra.mxu1 %vm524_vm3, %v353_v27 }
  0x52   : > { %974 = vmatmul.msk.f32.gmra.mxu1 %vm524_vm3, %v354_v28 }
  0x5a   : > { %975 = vmatmul.msk.f32.gmra.mxu1 %vm524_vm3, %v355_v29 }
  0x62   : > { %976 = vmatmul.msk.f32.gmra.mxu1 %vm524_vm3, %v356_v34 }
  0x6a   : > { %977 = vmatmul.msk.f32.gmra.mxu1 %vm524_vm3, %v357_v37 }
  0x72   : > { %978 = vmatmul.msk.f32.gmra.mxu1 %vm524_vm3, %v358_v39 }
  0x96   : > { %v332_v6 = vpop.xlane.xlu0 %331 }
  0x97   : > { %v333_v7 = vmul.f32 0.00390625, %v332_v6  ;;  %v1345_v62 = vpop.f32.mrf.mxu1  ;;  %v755_v6 = vld [vmem:[%s1550_s6 + $0x58] sm:$0xff] }
  0x99   : > { %953 = vmatpush.msk.msra.mxu0 %vm327_vm0, %v333_v7  ;;  %v361_v7 = vld [vmem:[%s1548_s4 + $0x10] sm:$0xff] }
  0x9a   : > { %954 = vmatmul.msk.f32.vlgmr.msra.gmra.mxu0 %vm371_vm1, %v335_v8  ;;  %v748_v8 = vld [vmem:[%s1550_s6 + $0x20] sm:$0xff] }
  0x9f   : > { %v1356_v5 = vpop.f32.mrf.mxu1 }
  0xa2   : > { %955 = vmatmul.msk.f32.gmra.mxu0 %vm371_vm1, %v336_v9 }
  0xaa   : > { %956 = vmatmul.msk.f32.gmra.mxu0 %vm371_vm1, %v337_v10  ;;  %v752_v10 = vld [vmem:[%s1550_s6 + $0x40] sm:$0xff] }
  0xb2   : > { %957 = vmatmul.msk.f32.gmra.mxu0 %vm371_vm1, %v338_v11  ;;  %v1370_v11 = vpop.f32.mrf.mxu1 }
  0xba   : > { %958 = vmatmul.msk.f32.gmra.mxu0 %vm371_vm1, %v339_v12  ;;  %v359_v12 = vld [vmem:[%s1548_s4] sm:$0xff]  ;;  %v591_v16 = vpop.f32.mrf.mxu1 }
  0xc2   : > { %959 = vmatmul.msk.f32.gmra.mxu0 %vm371_vm1, %v340_v13  ;;  %v745_v13 = vld [vmem:[%s1550_s6 + $0x8] sm:$0xff]  ;;  %v594_v19 = vpop.f32.mrf.mxu1 }
  0xca   : > { %960 = vmatmul.msk.f32.gmra.mxu0 %vm371_vm1, %v341_v14 }
  0xd2   : > { %961 = vmatmul.msk.f32.gmra.mxu0 %vm371_vm1, %v342_v15  ;;  %v749_v15 = vld [vmem:[%s1550_s6 + $0x28] sm:$0xff] }
  0xda   : > { %962 = vmatmul.msk.f32.gmra.mxu0 %vm371_vm1, %v343_v18  ;;  %v746_v18 = vld [vmem:[%s1550_s6 + $0x10] sm:$0xff] }
  0xe2   : > { %963 = vmatmul.msk.f32.gmra.mxu0 %vm371_vm1, %v344_v20  ;;  %v750_v20 = vld [vmem:[%s1550_s6 + $0x30] sm:$0xff] }
  0xea   : > { %964 = vmatmul.msk.f32.gmra.mxu0 %vm371_vm1, %v345_v22  ;;  %v597_v22 = vpop.f32.mrf.mxu1 }
  0xf2   : > { %965 = vmatmul.msk.f32.gmra.mxu0 %vm371_vm1, %v346_v24  ;;  %v600_v24 = vpop.f32.mrf.mxu1 }
  0xfa   : > { %v603_v25 = vpop.f32.mrf.mxu1 }
 0x102   : > { %v606_v26 = vpop.f32.mrf.mxu1 }
 0x10a   : > { %v609_v27 = vpop.f32.mrf.mxu1 }
 0x112   : > { %v612_v29 = vpop.f32.mrf.mxu1 }
 0x117   : > { %v1303_v30 = vpop.f32.mrf.mxu0 }
 0x118   : > { %v429_v14 = vadd.f32 %v1303_v30, %v359_v12  ;;  %v636_v12 = vld [vmem:[%s1549_s5 + $0x30] sm:$0xff] }
 0x11f   : > { %v431_v31 = vpop.f32.mrf.mxu0 }
 0x120   : > { %v432_v1 = vadd.f32 %v431_v31, %v360_v61 }
 0x127   : > { %v434_v32 = vpop.f32.mrf.mxu0 }
 0x128   : > { %v435_v9 = vadd.f32 %v434_v32, %v361_v7  ;;  %v615_v32 = vpop.f32.mrf.mxu1  ;;  %v640_v7 = vld [vmem:[%s1549_s5 + $0x50] sm:$0xff] }
 0x12f   : > { %v437_v33 = vpop.f32.mrf.mxu0 }
 0x130   : > { %v438_v59 = vadd.f32 %v437_v33, %v362_v55 }
 0x137   : > { %v440_v35 = vpop.f32.mrf.mxu0 }
 0x138   : > { %v441_v4 = vadd.f32 %v440_v35, %v363_v2 }
 0x13f   : > { %v443_v38 = vpop.f32.mrf.mxu0 }
 0x140   : > { %v444_v51 = vadd.f32 %v443_v38, %v364_v48 }
 0x147   : > { %v446_v40 = vpop.f32.mrf.mxu0 }
 0x148   : > { %v447_v0 = vadd.f32 %v446_v40, %v365_v60 }
 0x14f   : > { %v449_v41 = vpop.f32.mrf.mxu0 }
 0x150   : > { %v450_v47 = vadd.f32 %v449_v41, %v366_v45 }
 0x157   : > { %v452_v43 = vpop.f32.mrf.mxu0 }
 0x158   : > { %v453_v44 = vadd.f32 %v452_v43, %v367_v42 }
 0x15a   : > { %506 = vperm.xlu2 %1049, %v453_v44  }
 0x15f   : > { %v455_v46 = vpop.f32.mrf.mxu0 }
 0x160   : > { %v456_v57 = vadd.f32 %v455_v46, %v368_v53 }
 0x162   : > { %501 = vperm.xlu2 %1049, %v450_v47  }
 0x167   : > { %v458_v50 = vpop.f32.mrf.mxu0 }
 0x168   : > { %v459_v52 = vadd.f32 %v458_v50, %v369_v49 }
 0x16a   : > { %516 = vperm.xlu1 %1048, %v459_v52   ;;  %491 = vperm.xlu2 %1049, %v444_v51  }
 0x16f   : > { %v461_v56 = vpop.f32.mrf.mxu0 }
 0x170   : > { %v462_v58 = vadd.f32 %v461_v56, %v370_v54 }
 0x172   : > { %521 = vperm.xlu0 %1047, %v462_v58   ;;  %511 = vperm.xlu1 %1048, %v456_v57  }
 0x173   : > { %481 = vperm.xlu2 %1049, %v438_v59  }
 0x17a   : > { %808 = vperm.xlu0 %1047, %v754_v63   ;;  %496 = vperm.xlu1 %1048, %v447_v0  }
 0x17b   : > { %471 = vperm.xlu2 %1049, %v432_v1  }
 0x182   : > { %793 = vperm.xlu0 %1047, %v751_v3   ;;  %486 = vperm.xlu1 %1048, %v441_v4   ;;  %v630_v3 = vld [vmem:[%s1549_s5] sm:$0xff] }
 0x183   : > { %813 = vperm.xlu2 %1049, %v755_v6   ;;  %v638_v4 = vld [vmem:[%s1549_s5 + $0x40] sm:$0xff]  ;;  %v632_v6 = vld [vmem:[%s1549_s5 + $0x10] sm:$0xff] }
 0x18a   : > { %778 = vperm.xlu0 %1047, %v748_v8   ;;  %476 = vperm.xlu1 %1048, %v435_v9   ;;  %v633_v8 = vld [vmem:[%s1549_s5 + $0x18] sm:$0xff] }
 0x18b   : > { %798 = vperm.xlu2 %1049, %v752_v10   ;;  %v641_v9 = vld [vmem:[%s1549_s5 + $0x58] sm:$0xff]  ;;  %v634_v10 = vld [vmem:[%s1549_s5 + $0x20] sm:$0xff] }
 0x192   : > { %763 = vperm.xlu0 %1047, %v745_v13   ;;  %466 = vperm.xlu1 %1048, %v429_v14   ;;  %v637_v13 = vld [vmem:[%s1549_s5 + $0x38] sm:$0xff] }
 0x193   : > { %783 = vperm.xlu2 %1049, %v749_v15  }
 0x19a   : > { %803 = vperm.xlu1 %1048, %v753_v17  }
 0x19b   : > { %768 = vperm.xlu2 %1049, %v746_v18  }
 0x1a2   : > { %788 = vperm.xlu1 %1048, %v750_v20  }
 0x1aa   : > { %773 = vperm.xlu1 %1048, %v747_v21  }
 0x1b2   : > { %758 = vperm.xlu1 %1048, %v744_v23  }
 0x1b4   : > { %v507_v28 = vpop.permute.xlu2 %506 }
 0x1b5   : > { %v607_v40 = vadd.f32 %v606_v26, %v507_v28 }
 0x1b7   : > { %v1407_v45 = vmax.f32 %v607_v40, 0.0 }
 0x1bc   : > { %v502_v30 = vpop.permute.xlu2 %501 }
 0x1bd   : > { %v604_v42 = vadd.f32 %v603_v25, %v502_v30 }
 0x1bf   : > { %v1411_v47 = vmax.f32 %v604_v42, 0.0 }
 0x1c4   : > { %v492_v37 = vpop.permute.xlu2 %491 }
 0x1c5   : > { %v598_v48 = vadd.f32 %v597_v22, %v492_v37 }
 0x1c7   : > { %v1419_v51 = vmax.f32 %v598_v48, 0.0 }
 0x1cd   : > { %v482_v49 = vpop.permute.xlu2 %481 }
 0x1ce   : > { %v592_v53 = vadd.f32 %v591_v16, %v482_v49 }
 0x1d0   : > { %v1427_v56 = vmax.f32 %v592_v53, 0.0 }
 0x1d5   : > { %v472_v57 = vpop.permute.xlu2 %471 }
 0x1d6   : > { %v586_v59 = vadd.f32 %v1356_v5, %v472_v57  ;;  %v639_v5 = vld [vmem:[%s1549_s5 + $0x48] sm:$0xff] }
 0x1d8   : > { %v1437_v63 = vmax.f32 %v586_v59, 0.0 }
 0x1dc   : > { %v517_v31 = vpop.permute.xlu1 %516 }
 0x1dd   : > { %v613_v35 = vadd.f32 %v612_v29, %v517_v31  ;;  %v814_v20 = vpop.permute.xlu2 %813 }
 0x1df   : > { %v1399_v41 = vmax.f32 %v613_v35, 0.0 }
 0x1e4   : > { %v522_v33 = vpop.permute.xlu0 %521  ;;  %v512_v34 = vpop.permute.xlu1 %511 }
 0x1e5   : > { %v616_v36 = vadd.f32 %v615_v32, %v522_v33  ;;  %v610_v39 = vadd.f32 %v609_v27, %v512_v34  ;;  %v799_v33 = vpop.permute.xlu2 %798 }
 0x1e7   : > { %v1397_v38 = vmax.f32 %v616_v36, 0.0  ;;  %v1403_v43 = vmax.f32 %v610_v39, 0.0 }
 0x1e9   : > { %683 = vmatpush.msra.mxu2 %v1397_v38  ;;  %995 = vmatpush.msra.mxu3 %v1397_v38 }
 0x1eb   : > { %684 = vmatpush.msra.mxu2 %v1399_v41  ;;  %996 = vmatpush.msra.mxu3 %v1399_v41 }
 0x1ec   : > { %v497_v44 = vpop.permute.xlu1 %496  ;;  %v809_v26 = vpop.permute.xlu0 %808 }
 0x1ed   : > { %v601_v46 = vadd.f32 %v600_v24, %v497_v44  ;;  %685 = vmatpush.msra.mxu2 %v1403_v43  ;;  %997 = vmatpush.msra.mxu3 %v1403_v43  ;;  %v784_v44 = vpop.permute.xlu2 %783 }
 0x1ef   : > { %686 = vmatpush.msra.mxu2 %v1407_v45  ;;  %998 = vmatpush.msra.mxu3 %v1407_v45  ;;  %v1415_v50 = vmax.f32 %v601_v46, 0.0 }
 0x1f1   : > { %687 = vmatpush.msra.mxu2 %v1411_v47  ;;  %999 = vmatpush.msra.mxu3 %v1411_v47 }
 0x1f3   : > { %688 = vmatpush.msra.mxu2 %v1415_v50  ;;  %1000 = vmatpush.msra.mxu3 %v1415_v50 }
 0x1f4   : > { %v487_v52 = vpop.permute.xlu1 %486 }
 0x1f5   : > { %v595_v54 = vadd.f32 %v594_v19, %v487_v52  ;;  %689 = vmatpush.msra.mxu2 %v1419_v51  ;;  %1001 = vmatpush.msra.mxu3 %v1419_v51 }
 0x1f7   : > { %v1425_v55 = vmax.f32 %v595_v54, 0.0 }
 0x1f9   : > { %690 = vmatpush.msra.mxu2 %v1425_v55  ;;  %1002 = vmatpush.msra.mxu3 %v1425_v55 }
 0x1fb   : > { %691 = vmatpush.msra.mxu2 %v1427_v56  ;;  %1003 = vmatpush.msra.mxu3 %v1427_v56 }
 0x1fc   : > { %v477_v58 = vpop.permute.xlu1 %476 }
 0x1fd   : > { %v589_v60 = vadd.f32 %v1370_v11, %v477_v58  ;;  %v635_v11 = vld [vmem:[%s1549_s5 + $0x28] sm:$0xff] }
 0x1ff   : > { %v1435_v61 = vmax.f32 %v589_v60, 0.0 }
 0x201   : > { %692 = vmatpush.msra.mxu2 %v1435_v61  ;;  %1004 = vmatpush.msra.mxu3 %v1435_v61 }
 0x203   : > { %693 = vmatpush.msra.mxu2 %v1437_v63  ;;  %1005 = vmatpush.msra.mxu3 %v1437_v63 }
 0x204   : > { %v467_v0 = vpop.permute.xlu1 %466 }
 0x205   : > { %v583_v1 = vadd.f32 %v1345_v62, %v467_v0  ;;  %v631_v62 = vld [vmem:[%s1549_s5 + $0x8] sm:$0xff] }
 0x207   : > { %v1444_v2 = vmax.f32 %v583_v1, 0.0 }
 0x209   : > { %694 = vmatpush.msra.mxu2 %v1444_v2  ;;  %1006 = vmatpush.msra.mxu3 %v1444_v2 }
 0x20a   : > { %979 = vmatmul.msk.f32.vlgmr.msra.gmra.mxu2 %vm642_vm4, %v630_v3  ;;  %987 = vmatmul.msk.f32.vlgmr.msra.gmra.mxu3 %vm642_vm4, %v638_v4  ;;  %v769_v4 = vpop.permute.xlu2 %768 }
 0x20c   : > { %v804_v30 = vpop.permute.xlu1 %803 }
 0x212   : > { %980 = vmatmul.msk.f32.gmra.mxu2 %vm642_vm4, %v631_v62  ;;  %988 = vmatmul.msk.f32.gmra.mxu3 %vm642_vm4, %v639_v5 }
 0x214   : > { %v789_v42 = vpop.permute.xlu1 %788 }
 0x21a   : > { %981 = vmatmul.msk.f32.gmra.mxu2 %vm642_vm4, %v632_v6  ;;  %989 = vmatmul.msk.f32.gmra.mxu3 %vm642_vm4, %v640_v7 }
 0x21c   : > { %v774_v57 = vpop.permute.xlu1 %773 }
 0x222   : > { %982 = vmatmul.msk.f32.gmra.mxu2 %vm642_vm4, %v633_v8  ;;  %990 = vmatmul.msk.f32.gmra.mxu3 %vm642_vm4, %v641_v9 }
 0x224   : > { %v759_v7 = vpop.permute.xlu1 %758 }
 0x22a   : > { %983 = vmatmul.msk.f32.gmra.mxu2 %vm642_vm4, %v634_v10 }
 0x232   : > { %984 = vmatmul.msk.f32.gmra.mxu2 %vm642_vm4, %v635_v11 }
 0x23a   : > { %985 = vmatmul.msk.f32.gmra.mxu2 %vm642_vm4, %v636_v12 }
 0x242   : > { %986 = vmatmul.msk.f32.gmra.mxu2 %vm642_vm4, %v637_v13 }
 0x28d   : > { %v696_v14 = vpop.f32.mrf.mxu2  ;;  %v720_v15 = vpop.f32.mrf.mxu3 }
 0x28e   : > { %v740_v27 = vadd.f32 %v720_v15, %v1407_v45 }
 0x290   : > { %v824_v35 = vadd.f32 %v799_v33, %v740_v27 }
 0x292   : > { %v837_v39 = vmax.f32 %v824_v35, 0.0 }
 0x295   : > { %v699_v16 = vpop.f32.mrf.mxu2  ;;  %v723_v17 = vpop.f32.mrf.mxu3 }
 0x296   : > { %v741_v24 = vadd.f32 %v723_v17, %v1403_v43  ;;  %v733_v3 = vadd.f32 %v699_v16, %v1437_v63 }
 0x298   : > { %v825_v32 = vadd.f32 %v804_v30, %v741_v24 }
 0x29a   : > { %v838_v37 = vmax.f32 %v825_v32, 0.0 }
 0x29d   : > { %v702_v18 = vpop.f32.mrf.mxu2  ;;  %v726_v19 = vpop.f32.mrf.mxu3 }
 0x29e   : > { %v742_v21 = vadd.f32 %v726_v19, %v1399_v41  ;;  %v734_v0 = vadd.f32 %v702_v18, %v1435_v61 }
 0x2a0   : > { %v826_v29 = vadd.f32 %v809_v26, %v742_v21  ;;  %v818_v5 = vadd.f32 %v769_v4, %v734_v0 }
 0x2a2   : > { %v839_v34 = vmax.f32 %v826_v29, 0.0  ;;  %v831_v8 = vmax.f32 %v818_v5, 0.0 }
 0x2a5   : > { %v705_v22 = vpop.f32.mrf.mxu2  ;;  %v729_v23 = vpop.f32.mrf.mxu3 }
 0x2a6   : > { %v743_v25 = vadd.f32 %v729_v23, %v1397_v38  ;;  %v794_v38 = vpop.permute.xlu0 %793  ;;  %v735_v58 = vadd.f32 %v705_v22, %v1427_v56 }
 0x2a8   : > { %v827_v28 = vadd.f32 %v814_v20, %v743_v25 }
 0x2aa   : > { %v840_v31 = vmax.f32 %v827_v28, 0.0 }
 0x2ac   : > { %848 = vmatpush.msrb.mxu3 %v840_v31 }
 0x2ad   : > { %v708_v36 = vpop.f32.mrf.mxu2 }
 0x2ae   : > { %849 = vmatpush.msrb.mxu3 %v839_v34  ;;  %v779_v49 = vpop.permute.xlu0 %778  ;;  %v736_v52 = vadd.f32 %v708_v36, %v1425_v55  ;;  %v732_v55 = vadd.f32 %v696_v14, %v1444_v2  ;;  %v828_v2 = vld [vmem:[%s1551_s7] sm:$0x1] }
 0x2b0   : > { %850 = vmatpush.msrb.mxu3 %v838_v37  ;;  %v820_v1 = vadd.f32 %v779_v49, %v736_v52  ;;  %v816_v9 = vadd.f32 %v759_v7, %v732_v55 }
 0x2b2   : > { %851 = vmatpush.msrb.mxu3 %v837_v39  ;;  %v833_v62 = vmax.f32 %v820_v1, 0.0  ;;  %v829_v10 = vmax.f32 %v816_v9, 0.0 }
 0x2b5   : > { %v711_v40 = vpop.f32.mrf.mxu2 }
 0x2b6   : > { %v737_v46 = vadd.f32 %v711_v40, %v1419_v51  ;;  %v764_v56 = vpop.permute.xlu0 %763 }
 0x2b7   : > { %v817_v61 = vadd.f32 %v764_v56, %v733_v3 }
 0x2b8   : > { %v821_v60 = vadd.f32 %v784_v44, %v737_v46 }
 0x2b9   : > { %v830_v63 = vmax.f32 %v817_v61, 0.0 }
 0x2ba   : > { %v834_v51 = vmax.f32 %v821_v60, 0.0 }
 0x2bd   : > { %v714_v41 = vpop.f32.mrf.mxu2 }
 0x2be   : > { %v738_v43 = vadd.f32 %v714_v41, %v1415_v50 }
 0x2c0   : > { %v822_v54 = vadd.f32 %v789_v42, %v738_v43 }
 0x2c2   : > { %v835_v50 = vmax.f32 %v822_v54, 0.0 }
 0x2c5   : > { %v717_v45 = vpop.f32.mrf.mxu2 }
 0x2c6   : > { %v739_v48 = vadd.f32 %v717_v45, %v1411_v47  ;;  %v819_v47 = vadd.f32 %v774_v57, %v735_v58 }
 0x2c8   : > { %v823_v53 = vadd.f32 %v794_v38, %v739_v48  ;;  %v832_v6 = vmax.f32 %v819_v47, 0.0 }
 0x2ca   : > { %v836_v59 = vmax.f32 %v823_v53, 0.0 }
 0x2cc   : > { %852 = vmatpush.msrb.mxu3 %v836_v59 }
 0x2ce   : > { %853 = vmatpush.msrb.mxu3 %v835_v50 }
 0x2d0   : > { %854 = vmatpush.msrb.mxu3 %v834_v51 }
 0x2d2   : > { %855 = vmatpush.msrb.mxu3 %v833_v62 }
 0x2d4   : > { %856 = vmatpush.msrb.mxu3 %v832_v6 }
 0x2d6   : > { %857 = vmatpush.msrb.mxu3 %v831_v8 }
 0x2d8   : > { %858 = vmatpush.msrb.mxu3 %v830_v63 }
 0x2da   : > { %859 = vmatpush.msrb.mxu3 %v829_v10 }
 0x2db   : > { %991 = vmatmul.msk.f32.vlgmr.msrb.gmra.mxu3 %vm642_vm4, %v828_v2 }
 0x35e   : > { %v861_v11 = vpop.f32.mrf.mxu3 }
 0x35f   : > { %v862_v12 = vadd.f32 -0.15338722, %v861_v11 }
 0x361   : > { %865 = vst.msk [vmem:[%s310_s23] sm:$0x1] %vm864_vm5, %v862_v12 }
 0x362   : > { %1077 = shalt.err (!%p1074_p3)
}
 0x363   : > { %1007 = dma.vmem_to_hbm [thread:$0]  (%p1198_p5), %s878_s24, 16, %s880_s25, %s867_s26  }
 0x364 PF: > { %p1013_p4 = scmp.ge.s32.totalorder %s1112_s30, 2  ;;  %s891_s17 = sand.u32 1, %s1100_s27  }
 0x365   : > { %s892_s21 = scalar_lea.sflag [#allocation3], %s891_s17 }
 0x366   : > { %p1010_p7 = pnand %p1013_p4, %p1202_p6 }
 0x368   : > { %p1011_p8 = pneg %p1010_p7 }
 0x36a   : > { %1095 = dma.done.wait (%p1011_p8), %s892_s21, 16  }
 0x36b   : > { %1097 = vsyncadd (%p1011_p8), %s892_s21, 4294967280  ;;  %p18_p9 = scmp.ge.s32.totalorder %s1185_s11, 4   ;;  %s1555_s27 = smov %s1104_s28 }
 0x36c   : > { %s1556_s28 = smov %s1108_s29  ;;  %s1557_s29 = smov %s1196_s14 }
 0x36d   : > { %s1558_s30 = smov %s1185_s11  ;;  %20 = sbr.rel (!%p18_p9) target bundleno = 3 (0x3), region = 90 }
 0x372   :  { %897 = vsyncpa [#allocation3], 1 }
 0x373   :  { %899 = vsyncpa [#allocation3 + $0x1], 1 }

</bundles_post_ra>
